<compile_context>
chip_gen: v6e
topology: v6e:2x2x1
jax: 0.10.0
libtpu: 0.0.40
codegen_flags: <defaults>
</compile_context>

<pallas_src>
import jax
import jax.numpy as jnp
from jax.experimental import pallas as pl
from jax.experimental.pallas import tpu as pltpu

E_CHAR = 50
CONV_K = 5


def _round_up(x, m):
    return (x + m - 1) // m * m


def model_emb_kernel(ids_ref, emb_ref, wconv_ref, bconv_ref,
                     wproj_ref, bproj_ref, wgate_ref, bgate_ref,
                     o_ref):
    L, TN, _ = ids_ref.shape                 # (max_word_len, word-tile, 1) int32
    V, C = emb_ref.shape                     # (n_chars, e_char) bf16
    K = wconv_ref.shape[0]
    E = o_ref.shape[-1]
    T = L - K + 1                            # valid-conv output length

    # --- 1) Char-embedding gather as a one-hot MXU matmul (table stays in VMEM) ---
    ids = ids_ref[...]                                              # (L, TN, 1)
    one_hot = (ids == jax.lax.broadcasted_iota(jnp.int32, (L, TN, V), 2)
               ).astype(jnp.bfloat16)                               # (L, TN, V)
    x = jnp.dot(one_hot.reshape(L * TN, V), emb_ref[...],
                preferred_element_type=jnp.float32)                 # (L*TN, C) f32
    x = x.astype(jnp.bfloat16).reshape(L, TN, C)                    # (L, TN, C) bf16

    # --- 2) Conv1d(k=K) as K shifted matmuls, f32 accumulation ---
    # conv[t, n, e] = sum_{j, c} x[t+j, n, c] * w[j, c, e]
    acc = jnp.dot(x[0:T].reshape(T * TN, C), wconv_ref[0],
                  preferred_element_type=jnp.float32)               # (T*TN, E)
    for j in range(1, K):                                           # K-1 more taps
        acc = acc + jnp.dot(x[j:j + T].reshape(T * TN, C), wconv_ref[j],
                            preferred_element_type=jnp.float32)

    # --- 3) Max-over-time; bias + ReLU hoisted out of the time loop ---
    conv_max = jnp.max(acc.reshape(T, TN, E), axis=0)               # (TN, E) f32
    conv_max = jnp.maximum(conv_max + bconv_ref[...], 0.0)

    # --- 4) Highway ---
    h = conv_max.astype(jnp.bfloat16)
    x_proj = jnp.maximum(
        jnp.dot(h, wproj_ref[...], preferred_element_type=jnp.float32)
        + bproj_ref[...], 0.0)
    x_gate = jax.nn.sigmoid(
        jnp.dot(h, wgate_ref[...], preferred_element_type=jnp.float32)
        + bgate_ref[...])
    out = x_gate * x_proj + (1.0 - x_gate) * conv_max

    # TODO(synk): Dropout(p=0.3) is identity in eval mode; training-mode RNG mask omitted.
    # Note: E=32 makes the output store lane-sparse (32/128 lanes); acceptable here
    # since output bytes are tiny relative to compute. Revisit if measured store-bound.
    o_ref[...] = out.astype(o_ref.dtype)


def prepare_params(emb_table, w_conv, b_conv, w_proj, b_proj, w_gate, b_gate):
    """One-time weight preprocessing (hoist out of the per-step hot path)."""
    E = w_conv.shape[0]
    return (
        emb_table.astype(jnp.bfloat16),                          # (V, C)
        jnp.transpose(w_conv, (2, 1, 0)).astype(jnp.bfloat16),   # (K, C, E)
        b_conv.reshape(1, E).astype(jnp.float32),
        jnp.transpose(w_proj).astype(jnp.bfloat16),              # (E, E) in->out
        b_proj.reshape(1, E).astype(jnp.float32),
        jnp.transpose(w_gate).astype(jnp.bfloat16),
        b_gate.reshape(1, E).astype(jnp.float32),
    )


def model_embeddings_forward(char_ids, params, embed_size, *, tile_n=256):
    """char_ids: (sentence_length, batch, max_word_length) int32 ->
       (sentence_length, batch, embed_size) f32"""
    emb_bf16, w_conv_k, b_conv2, w_proj_t, b_proj2, w_gate_t, b_gate2 = params
    S, B, L = char_ids.shape
    V, C = emb_bf16.shape
    K = w_conv_k.shape[0]
    E = embed_size
    if L < K:
        raise ValueError(f"max_word_length={L} must be >= conv kernel width {K}")

    N = S * B
    tn = min(tile_n, _round_up(N, 8))        # words per grid step (fits every chip's VMEM)
    n_pad = _round_up(N, tn)

    # (S, B, L) -> (L, N, 1): N on its own blocked axis; trailing singleton makes the
    # in-kernel one-hot compare a pure lane broadcast. HBM traffic stays N*L*4 bytes.
    ids = jnp.transpose(char_ids.reshape(N, L))[:, :, None]     # (L, N, 1)
    ids = jnp.pad(ids, ((0, 0), (0, n_pad - N), (0, 0)))

    out = pl.pallas_call(
        model_emb_kernel,
        out_shape=jax.ShapeDtypeStruct((n_pad, E), jnp.float32),
        grid_spec=pltpu.PrefetchScalarGridSpec(
            num_scalar_prefetch=0,
            grid=(n_pad // tn,),
            in_specs=[
                pl.BlockSpec((L, tn, 1), lambda i: (0, i, 0)),      # char ids (streamed)
                pl.BlockSpec((V, C), lambda i: (0, 0)),             # emb table (resident)
                pl.BlockSpec((K, C, E), lambda i: (0, 0, 0)),       # conv weight (resident)
                pl.BlockSpec((1, E), lambda i: (0, 0)),             # conv bias
                pl.BlockSpec((E, E), lambda i: (0, 0)),             # highway proj W
                pl.BlockSpec((1, E), lambda i: (0, 0)),             # highway proj b
                pl.BlockSpec((E, E), lambda i: (0, 0)),             # highway gate W
                pl.BlockSpec((1, E), lambda i: (0, 0)),             # highway gate b
            ],
            out_specs=pl.BlockSpec((tn, E), lambda i: (i, 0)),
        ),
        compiler_params=pltpu.CompilerParams(
            dimension_semantics=("parallel",),
            vmem_limit_bytes=32 * 1024 * 1024,
        ),
    )(ids, emb_bf16, w_conv_k, b_conv2, w_proj_t, b_proj2, w_gate_t, b_gate2)

    return out[:N].reshape(S, B, E)


def reference_forward(char_ids, emb_table, w_conv, b_conv,
                      w_proj, b_proj, w_gate, b_gate):
    """Pure-JAX f32 reference of the PyTorch module (eval mode)."""
    S, B, L = char_ids.shape
    K = w_conv.shape[-1]
    T = L - K + 1
    x = emb_table[char_ids]                                        # (S, B, L, C)
    conv = jnp.stack(
        [jnp.einsum('sbkc,eck->sbe', x[:, :, t:t + K, :], w_conv) for t in range(T)],
        axis=2) + b_conv[None, None, None, :]                      # (S, B, T, E)
    conv_max = jnp.max(jax.nn.relu(conv), axis=2)                  # (S, B, E)
    x_proj = jax.nn.relu(conv_max @ w_proj.T + b_proj)
    x_gate = jax.nn.sigmoid(conv_max @ w_gate.T + b_gate)
    return x_gate * x_proj + (1.0 - x_gate) * conv_max


if __name__ == "__main__":
    # Small, module-consistent shapes.
    embed_size = 32        # word embedding size (conv out channels / highway dim)
    vocab_size = 96        # number of characters
    pad_idx = 0            # vocab.char2id['<pad>']
    sent_len, batch, max_word_len = 4, 2, 12

    key = jax.random.PRNGKey(0)
    k_emb, k_wc, k_bc, k_wp, k_bp, k_wg, k_bg, k_in = jax.random.split(key, 8)

    emb_table = 0.1 * jax.random.normal(k_emb, (vocab_size, E_CHAR), jnp.float32)
    emb_table = emb_table.at[pad_idx].set(0.0)          # padding_idx row is zero

    w_conv = 0.1 * jax.random.normal(k_wc, (embed_size, E_CHAR, CONV_K), jnp.float32)
    b_conv = 0.1 * jax.random.normal(k_bc, (embed_size,), jnp.float32)
    w_proj = 0.1 * jax.random.normal(k_wp, (embed_size, embed_size), jnp.float32)
    b_proj = 0.1 * jax.random.normal(k_bp, (embed_size,), jnp.float32)
    w_gate = 0.1 * jax.random.normal(k_wg, (embed_size, embed_size), jnp.float32)
    b_gate = 0.1 * jax.random.normal(k_bg, (embed_size,), jnp.float32)

    char_ids = jax.random.randint(k_in, (sent_len, batch, max_word_len),
                                  0, vocab_size, dtype=jnp.int32)

    params = prepare_params(emb_table, w_conv, b_conv, w_proj, b_proj, w_gate, b_gate)
    out = model_embeddings_forward(char_ids, params, embed_size)
    out = jax.block_until_ready(out)

    ref = reference_forward(char_ids, emb_table, w_conv, b_conv,
                            w_proj, b_proj, w_gate, b_gate)

    assert out.shape == (sent_len, batch, embed_size)
    assert bool(jnp.all(jnp.isfinite(out)))
    max_diff = float(jnp.max(jnp.abs(out - ref)))
    assert max_diff < 1e-1, f"kernel vs reference max abs diff {max_diff}"
    print("KERNEL_OK")
</pallas_src>

<mosaic_0001>
module attributes {stable_mosaic.version = 11 : i64} {
  func.func @model_emb_kernel(%arg0: i32, %arg1: memref<12x8x1xi32, #tpu.memory_space<vmem>>, %arg2: memref<96x50xbf16, #tpu.memory_space<vmem>>, %arg3: memref<5x50x32xbf16, #tpu.memory_space<vmem>>, %arg4: memref<1x32xf32, #tpu.memory_space<vmem>>, %arg5: memref<32x32xbf16, #tpu.memory_space<vmem>>, %arg6: memref<1x32xf32, #tpu.memory_space<vmem>>, %arg7: memref<32x32xbf16, #tpu.memory_space<vmem>>, %arg8: memref<1x32xf32, #tpu.memory_space<vmem>>, %arg9: memref<8x32xf32, #tpu.memory_space<vmem>>) attributes {dimension_semantics = [#tpu.dimension_semantics<parallel>], iteration_bounds = array<i64: 1>, scalar_prefetch = 0 : i64, scratch_operands = 0 : i64, tpu.core_type = #tpu.core_type<tc>, window_params = [{transform_indices = @transform_0, window_bounds = array<i64: 12, 8, 1>}, {pipeline_mode = #tpu.pipeline_mode<synchronous>, transform_indices = @transform_1, window_bounds = array<i64: 96, 50>}, {pipeline_mode = #tpu.pipeline_mode<synchronous>, transform_indices = @transform_2, window_bounds = array<i64: 5, 50, 32>}, {pipeline_mode = #tpu.pipeline_mode<synchronous>, transform_indices = @transform_3, window_bounds = array<i64: 1, 32>}, {pipeline_mode = #tpu.pipeline_mode<synchronous>, transform_indices = @transform_4, window_bounds = array<i64: 32, 32>}, {pipeline_mode = #tpu.pipeline_mode<synchronous>, transform_indices = @transform_5, window_bounds = array<i64: 1, 32>}, {pipeline_mode = #tpu.pipeline_mode<synchronous>, transform_indices = @transform_6, window_bounds = array<i64: 32, 32>}, {pipeline_mode = #tpu.pipeline_mode<synchronous>, transform_indices = @transform_7, window_bounds = array<i64: 1, 32>}, {transform_indices = @transform_8, window_bounds = array<i64: 8, 32>}]} {
    %c0 = arith.constant 0 : index
    %c0_0 = arith.constant 0 : index
    %c0_1 = arith.constant 0 : index
    %0 = vector.load %arg1[%c0, %c0_0, %c0_1] : memref<12x8x1xi32, #tpu.memory_space<vmem>>, vector<12x8x1xi32>
    %1 = tpu.iota {dimensions = array<i32: 2>} : vector<12x8x96xi32>
    %2 = vector.broadcast %0 : vector<12x8x1xi32> to vector<12x8x96xi32>
    %3 = arith.cmpi eq, %2, %1 : vector<12x8x96xi32>
    %4 = arith.extui %3 : vector<12x8x96xi1> to vector<12x8x96xi32>
    %5 = arith.sitofp %4 : vector<12x8x96xi32> to vector<12x8x96xf32>
    %6 = arith.truncf %5 : vector<12x8x96xf32> to vector<12x8x96xbf16>
    %7 = vector.shape_cast %6 : vector<12x8x96xbf16> to vector<96x96xbf16>
    %c0_2 = arith.constant 0 : index
    %c0_3 = arith.constant 0 : index
    %8 = vector.load %arg2[%c0_2, %c0_3] : memref<96x50xbf16, #tpu.memory_space<vmem>>, vector<96x50xbf16>
    %cst = arith.constant dense<0.000000e+00> : vector<96x50xf32>
    %9 = tpu.matmul %7, %8, %cst {dimension_numbers = #tpu.dot_dimension_numbers<[1], [0], [0], [1], [0, 0, 1, 1], [], []>} : vector<96x96xbf16>, vector<96x50xbf16>, vector<96x50xf32> -> vector<96x50xf32>
    %10 = arith.truncf %9 : vector<96x50xf32> to vector<96x50xbf16>
    %11 = vector.shape_cast %10 : vector<96x50xbf16> to vector<12x8x50xbf16>
    %12 = vector.extract_strided_slice %11 {offsets = [0, 0, 0], sizes = [8, 8, 50], strides = [1, 1, 1]} : vector<12x8x50xbf16> to vector<8x8x50xbf16>
    %13 = vector.shape_cast %12 : vector<8x8x50xbf16> to vector<64x50xbf16>
    %c0_4 = arith.constant 0 : index
    %c0_5 = arith.constant 0 : index
    %c0_6 = arith.constant 0 : index
    %14 = vector.load %arg3[%c0_4, %c0_5, %c0_6] : memref<5x50x32xbf16, #tpu.memory_space<vmem>>, vector<1x50x32xbf16>
    %15 = vector.shape_cast %14 : vector<1x50x32xbf16> to vector<50x32xbf16>
    %cst_7 = arith.constant dense<0.000000e+00> : vector<64x32xf32>
    %16 = tpu.matmul %13, %15, %cst_7 {dimension_numbers = #tpu.dot_dimension_numbers<[1], [0], [0], [1], [0, 0, 1, 1], [], []>} : vector<64x50xbf16>, vector<50x32xbf16>, vector<64x32xf32> -> vector<64x32xf32>
    %17 = vector.extract_strided_slice %11 {offsets = [1, 0, 0], sizes = [8, 8, 50], strides = [1, 1, 1]} : vector<12x8x50xbf16> to vector<8x8x50xbf16>
    %18 = vector.shape_cast %17 : vector<8x8x50xbf16> to vector<64x50xbf16>
    %c1 = arith.constant 1 : index
    %c0_8 = arith.constant 0 : index
    %c0_9 = arith.constant 0 : index
    %19 = vector.load %arg3[%c1, %c0_8, %c0_9] : memref<5x50x32xbf16, #tpu.memory_space<vmem>>, vector<1x50x32xbf16>
    %20 = vector.shape_cast %19 : vector<1x50x32xbf16> to vector<50x32xbf16>
    %cst_10 = arith.constant dense<0.000000e+00> : vector<64x32xf32>
    %21 = tpu.matmul %18, %20, %cst_10 {dimension_numbers = #tpu.dot_dimension_numbers<[1], [0], [0], [1], [0, 0, 1, 1], [], []>} : vector<64x50xbf16>, vector<50x32xbf16>, vector<64x32xf32> -> vector<64x32xf32>
    %22 = arith.addf %16, %21 : vector<64x32xf32>
    %23 = vector.extract_strided_slice %11 {offsets = [2, 0, 0], sizes = [8, 8, 50], strides = [1, 1, 1]} : vector<12x8x50xbf16> to vector<8x8x50xbf16>
    %24 = vector.shape_cast %23 : vector<8x8x50xbf16> to vector<64x50xbf16>
    %c2 = arith.constant 2 : index
    %c0_11 = arith.constant 0 : index
    %c0_12 = arith.constant 0 : index
    %25 = vector.load %arg3[%c2, %c0_11, %c0_12] : memref<5x50x32xbf16, #tpu.memory_space<vmem>>, vector<1x50x32xbf16>
    %26 = vector.shape_cast %25 : vector<1x50x32xbf16> to vector<50x32xbf16>
    %cst_13 = arith.constant dense<0.000000e+00> : vector<64x32xf32>
    %27 = tpu.matmul %24, %26, %cst_13 {dimension_numbers = #tpu.dot_dimension_numbers<[1], [0], [0], [1], [0, 0, 1, 1], [], []>} : vector<64x50xbf16>, vector<50x32xbf16>, vector<64x32xf32> -> vector<64x32xf32>
    %28 = arith.addf %22, %27 : vector<64x32xf32>
    %29 = vector.extract_strided_slice %11 {offsets = [3, 0, 0], sizes = [8, 8, 50], strides = [1, 1, 1]} : vector<12x8x50xbf16> to vector<8x8x50xbf16>
    %30 = vector.shape_cast %29 : vector<8x8x50xbf16> to vector<64x50xbf16>
    %c3 = arith.constant 3 : index
    %c0_14 = arith.constant 0 : index
    %c0_15 = arith.constant 0 : index
    %31 = vector.load %arg3[%c3, %c0_14, %c0_15] : memref<5x50x32xbf16, #tpu.memory_space<vmem>>, vector<1x50x32xbf16>
    %32 = vector.shape_cast %31 : vector<1x50x32xbf16> to vector<50x32xbf16>
    %cst_16 = arith.constant dense<0.000000e+00> : vector<64x32xf32>
    %33 = tpu.matmul %30, %32, %cst_16 {dimension_numbers = #tpu.dot_dimension_numbers<[1], [0], [0], [1], [0, 0, 1, 1], [], []>} : vector<64x50xbf16>, vector<50x32xbf16>, vector<64x32xf32> -> vector<64x32xf32>
    %34 = arith.addf %28, %33 : vector<64x32xf32>
    %35 = vector.extract_strided_slice %11 {offsets = [4, 0, 0], sizes = [8, 8, 50], strides = [1, 1, 1]} : vector<12x8x50xbf16> to vector<8x8x50xbf16>
    %36 = vector.shape_cast %35 : vector<8x8x50xbf16> to vector<64x50xbf16>
    %c4 = arith.constant 4 : index
    %c0_17 = arith.constant 0 : index
    %c0_18 = arith.constant 0 : index
    %37 = vector.load %arg3[%c4, %c0_17, %c0_18] : memref<5x50x32xbf16, #tpu.memory_space<vmem>>, vector<1x50x32xbf16>
    %38 = vector.shape_cast %37 : vector<1x50x32xbf16> to vector<50x32xbf16>
    %cst_19 = arith.constant dense<0.000000e+00> : vector<64x32xf32>
    %39 = tpu.matmul %36, %38, %cst_19 {dimension_numbers = #tpu.dot_dimension_numbers<[1], [0], [0], [1], [0, 0, 1, 1], [], []>} : vector<64x50xbf16>, vector<50x32xbf16>, vector<64x32xf32> -> vector<64x32xf32>
    %40 = arith.addf %34, %39 : vector<64x32xf32>
    %41 = vector.shape_cast %40 : vector<64x32xf32> to vector<8x8x32xf32>
    %cst_20 = arith.constant dense<0xFF800000> : vector<8x32xf32>
    %42 = vector.multi_reduction <maximumf>, %41, %cst_20 [0] : vector<8x8x32xf32> to vector<8x32xf32>
    %c0_21 = arith.constant 0 : index
    %c0_22 = arith.constant 0 : index
    %43 = vector.load %arg4[%c0_21, %c0_22] : memref<1x32xf32, #tpu.memory_space<vmem>>, vector<1x32xf32>
    %44 = vector.broadcast %43 : vector<1x32xf32> to vector<8x32xf32>
    %45 = arith.addf %42, %44 : vector<8x32xf32>
    %cst_23 = arith.constant 0.000000e+00 : f32
    %46 = vector.broadcast %cst_23 : f32 to vector<8x32xf32>
    %47 = arith.maximumf %45, %46 : vector<8x32xf32>
    %48 = arith.truncf %47 : vector<8x32xf32> to vector<8x32xbf16>
    %c0_24 = arith.constant 0 : index
    %c0_25 = arith.constant 0 : index
    %49 = vector.load %arg5[%c0_24, %c0_25] : memref<32x32xbf16, #tpu.memory_space<vmem>>, vector<32x32xbf16>
    %cst_26 = arith.constant dense<0.000000e+00> : vector<8x32xf32>
    %50 = tpu.matmul %48, %49, %cst_26 {dimension_numbers = #tpu.dot_dimension_numbers<[1], [0], [0], [1], [0, 0, 1, 1], [], []>} : vector<8x32xbf16>, vector<32x32xbf16>, vector<8x32xf32> -> vector<8x32xf32>
    %c0_27 = arith.constant 0 : index
    %c0_28 = arith.constant 0 : index
    %51 = vector.load %arg6[%c0_27, %c0_28] : memref<1x32xf32, #tpu.memory_space<vmem>>, vector<1x32xf32>
    %52 = vector.broadcast %51 : vector<1x32xf32> to vector<8x32xf32>
    %53 = arith.addf %50, %52 : vector<8x32xf32>
    %cst_29 = arith.constant 0.000000e+00 : f32
    %54 = vector.broadcast %cst_29 : f32 to vector<8x32xf32>
    %55 = arith.maximumf %53, %54 : vector<8x32xf32>
    %c0_30 = arith.constant 0 : index
    %c0_31 = arith.constant 0 : index
    %56 = vector.load %arg7[%c0_30, %c0_31] : memref<32x32xbf16, #tpu.memory_space<vmem>>, vector<32x32xbf16>
    %cst_32 = arith.constant dense<0.000000e+00> : vector<8x32xf32>
    %57 = tpu.matmul %48, %56, %cst_32 {dimension_numbers = #tpu.dot_dimension_numbers<[1], [0], [0], [1], [0, 0, 1, 1], [], []>} : vector<8x32xbf16>, vector<32x32xbf16>, vector<8x32xf32> -> vector<8x32xf32>
    %c0_33 = arith.constant 0 : index
    %c0_34 = arith.constant 0 : index
    %58 = vector.load %arg8[%c0_33, %c0_34] : memref<1x32xf32, #tpu.memory_space<vmem>>, vector<1x32xf32>
    %59 = vector.broadcast %58 : vector<1x32xf32> to vector<8x32xf32>
    %60 = arith.addf %57, %59 : vector<8x32xf32>
    %61 = arith.negf %60 : vector<8x32xf32>
    %62 = math.exp %61 : vector<8x32xf32>
    %cst_35 = arith.constant 1.000000e+00 : f32
    %63 = vector.broadcast %cst_35 : f32 to vector<8x32xf32>
    %64 = arith.addf %63, %62 : vector<8x32xf32>
    %65 = arith.divf %63, %64 : vector<8x32xf32>
    %66 = arith.mulf %65, %55 : vector<8x32xf32>
    %cst_36 = arith.constant 1.000000e+00 : f32
    %67 = vector.broadcast %cst_36 : f32 to vector<8x32xf32>
    %68 = arith.subf %67, %65 : vector<8x32xf32>
    %69 = arith.mulf %68, %47 : vector<8x32xf32>
    %70 = arith.addf %66, %69 : vector<8x32xf32>
    %c0_37 = arith.constant 0 : index
    %c0_38 = arith.constant 0 : index
    %71 = vector.load %arg9[%c0_37, %c0_38] : memref<8x32xf32, #tpu.memory_space<vmem>>, vector<8x32xf32>
    tpu.vector_store %arg9[%c0_37, %c0_38], %70 {strides = array<i32>} : memref<8x32xf32, #tpu.memory_space<vmem>>, vector<8x32xf32>,
    return
  }
  func.func @transform_0(%arg0: i32) -> (i32, i32, i32) {
    %c0_i32 = arith.constant 0 : i32
    %c0_i32_0 = arith.constant 0 : i32
    %c0_i32_1 = arith.constant 0 : i32
    return %c0_i32, %arg0, %c0_i32_0 : i32, i32, i32
  }
  func.func @transform_1(%arg0: i32) -> (i32, i32) {
    %c0_i32 = arith.constant 0 : i32
    %c0_i32_0 = arith.constant 0 : i32
    %c0_i32_1 = arith.constant 0 : i32
    return %c0_i32, %c0_i32_0 : i32, i32
  }
  func.func @transform_2(%arg0: i32) -> (i32, i32, i32) {
    %c0_i32 = arith.constant 0 : i32
    %c0_i32_0 = arith.constant 0 : i32
    %c0_i32_1 = arith.constant 0 : i32
    %c0_i32_2 = arith.constant 0 : i32
    return %c0_i32, %c0_i32_0, %c0_i32_1 : i32, i32, i32
  }
  func.func @transform_3(%arg0: i32) -> (i32, i32) {
    %c0_i32 = arith.constant 0 : i32
    %c0_i32_0 = arith.constant 0 : i32
    %c0_i32_1 = arith.constant 0 : i32
    return %c0_i32, %c0_i32_0 : i32, i32
  }
  func.func @transform_4(%arg0: i32) -> (i32, i32) {
    %c0_i32 = arith.constant 0 : i32
    %c0_i32_0 = arith.constant 0 : i32
    %c0_i32_1 = arith.constant 0 : i32
    return %c0_i32, %c0_i32_0 : i32, i32
  }
  func.func @transform_5(%arg0: i32) -> (i32, i32) {
    %c0_i32 = arith.constant 0 : i32
    %c0_i32_0 = arith.constant 0 : i32
    %c0_i32_1 = arith.constant 0 : i32
    return %c0_i32, %c0_i32_0 : i32, i32
  }
  func.func @transform_6(%arg0: i32) -> (i32, i32) {
    %c0_i32 = arith.constant 0 : i32
    %c0_i32_0 = arith.constant 0 : i32
    %c0_i32_1 = arith.constant 0 : i32
    return %c0_i32, %c0_i32_0 : i32, i32
  }
  func.func @transform_7(%arg0: i32) -> (i32, i32) {
    %c0_i32 = arith.constant 0 : i32
    %c0_i32_0 = arith.constant 0 : i32
    %c0_i32_1 = arith.constant 0 : i32
    return %c0_i32, %c0_i32_0 : i32, i32
  }
  func.func @transform_8(%arg0: i32) -> (i32, i32) {
    %c0_i32 = arith.constant 0 : i32
    %c0_i32_0 = arith.constant 0 : i32
    return %arg0, %c0_i32 : i32, i32
  }
}

</mosaic_0001>

<bundles_post_ra>
// kernel: tpu_custom_call.1
= control target key start
LH: loop header
LB: loop body
LE: loop exit
PB: predicated region body
PF: predicated region fallthrough
CT: control target
= control target key end

     0   :  { %v1425_v2 = vmov 0   ;;  %s1692_s0 = inlined_call_operand.vmem [shape: s32[12,8,1], index: 0, kind: input, shape index: {}]   ;;  %s1693_s1 = inlined_call_operand.vmem [shape: bf16[96,50], index: 1, kind: input, shape index: {}]   ;;  %s1694_s2 = inlined_call_operand.vmem [shape: bf16[5,50,32], index: 2, kind: input, shape index: {}]   ;;  %s1695_s3 = inlined_call_operand.vmem [shape: f32[1,32], index: 3, kind: input, shape index: {}]   ;;  %s1696_s4 = inlined_call_operand.vmem [shape: bf16[32,32], index: 4, kind: input, shape index: {}]   ;;  %s1697_s5 = inlined_call_operand.vmem [shape: f32[1,32], index: 5, kind: input, shape index: {}]   ;;  %s1698_s6 = inlined_call_operand.vmem [shape: bf16[32,32], index: 6, kind: input, shape index: {}]   ;;  %s1699_s7 = inlined_call_operand.vmem [shape: f32[1,32], index: 7, kind: input, shape index: {}]   ;;  %s1700_s8 = inlined_call_operand.hbm [shape: f32[8,32], index: 8, kind: output, shape index: {}]  }
   0x1   :  { %v33_v0 = vld [vmem:[%s1692_s0 + $0x10] sm:$0xff]  ;;  %v31_v1 = vld [vmem:[%s1692_s0] sm:$0xff]  ;;  %1368 = vset.pattern.permute.xlu1 %v1425_v2  ;;  %1367 = vset.pattern.permute.xlu0 %v1425_v2  ;;  %v34_v3 = vld [vmem:[%s1692_s0 + $0x18] sm:$0xff] }
   0x2   :  { %52 = vperm.xlu1 %1368, %v33_v0   ;;  %46 = vperm.xlu0 %1367, %v31_v1   ;;  %v32_v4 = vld [vmem:[%s1692_s0 + $0x8] sm:$0xff]  ;;  %v1370_v6 = vld [vmem:[%s1693_s1 + $0x20] sm:$0xff]   ;;  %v38_v9 = vld [vmem:[%s1692_s0 + $0x38] sm:$0xff] }
   0x3   :  { %v1369_v5 = vld [vmem:[%s1693_s1 + $0x28] sm:$0xff]   ;;  %v35_v8 = vld [vmem:[%s1692_s0 + $0x20] sm:$0xff]  ;;  %v37_v10 = vld [vmem:[%s1692_s0 + $0x30] sm:$0xff] }
   0x4   :  { %v36_v7 = vld [vmem:[%s1692_s0 + $0x28] sm:$0xff]  ;;  %1238 = vmatprep.subr.bf16.mxu0 %v1369_v5  ;;  %v1371_v11 = vld [vmem:[%s1693_s1 + $0x18] sm:$0xff]   ;;  %v1372_v12 = vld [vmem:[%s1693_s1 + $0x10] sm:$0xff]  }
   0x5   :  { %1239 = vmatpush3.bf16.msra.mxu0 %v1369_v5  ;;  %v40_v13 = vld [vmem:[%s1692_s0 + $0x48] sm:$0xff]  ;;  %v39_v14 = vld [vmem:[%s1692_s0 + $0x40] sm:$0xff]  ;;  %v42_v16 = vld [vmem:[%s1692_s0 + $0x58] sm:$0xff] }
   0x6   :  { %55 = vperm.xlu1 %1368, %v34_v3   ;;  %49 = vperm.xlu0 %1367, %v32_v4   ;;  %v1373_v15 = vld [vmem:[%s1693_s1 + $0x8] sm:$0xff]   ;;  %v41_v17 = vld [vmem:[%s1692_s0 + $0x50] sm:$0xff]  ;;  %v1374_v18 = vld [vmem:[%s1693_s1] sm:$0xff]  }
   0x7   :  { %1240 = vmatprep.subr.bf16.mxu0 %v1370_v6 }
   0x9   :  { %1241 = vmatpush3.bf16.msra.mxu0 %v1370_v6 }
   0xa   :  { %61 = vperm.xlu1 %1368, %v36_v7   ;;  %58 = vperm.xlu0 %1367, %v35_v8  }
   0xb   :  { %1242 = vmatprep.subr.bf16.mxu0 %v1371_v11 }
   0xd   :  { %1243 = vmatpush3.bf16.msra.mxu0 %v1371_v11 }
   0xe   :  { %67 = vperm.xlu1 %1368, %v38_v9   ;;  %64 = vperm.xlu0 %1367, %v37_v10  }
   0xf   :  { %1244 = vmatprep.subr.bf16.mxu0 %v1372_v12 }
  0x11   :  { %1245 = vmatpush3.bf16.msra.mxu0 %v1372_v12 }
  0x12   :  { %73 = vperm.xlu1 %1368, %v40_v13   ;;  %70 = vperm.xlu0 %1367, %v39_v14  }
  0x13   :  { %1246 = vmatprep.subr.bf16.mxu0 %v1373_v15 }
  0x15   :  { %1247 = vmatpush3.bf16.msra.mxu0 %v1373_v15 }
  0x16   :  { %79 = vperm.xlu1 %1368, %v42_v16   ;;  %76 = vperm.xlu0 %1367, %v41_v17  }
  0x17   :  { %13 = vsyncpa [#allocation3], 0  ;;  %1248 = vmatprep.subr.bf16.mxu0 %v1374_v18  ;;  %v43_v19 = vlaneseq  ;;  %vm207_vm4 = vcmask 785408   ;;  %v1426_v25 = vmov 0.0   ;;  %vm384_vm13 = vcmask 1040384   ;;  %v1377_v55 = vld [vmem:[%s1694_s2 + $0x48] sm:$0xff]  }
  0x18   :  { %v1375_v52 = vld [vmem:[%s1694_s2 + $0x50] ss:$0 sps:$4 sm:$0x11]   ;;  %v1376_v54 = vld [vmem:[%s1694_s2 + $0x34] ss:$0 sps:$4 sm:$0x11]  }
  0x19   :  { %1249 = vmatpush3.bf16.msra.mxu0 %v1374_v18  ;;  %v44_v20 = vand.u32 127, %v43_v19  ;;  %v592_v53 = vsel %vm384_vm13, %v1375_v52, 0  ;;  %1358 = vmatprep.subr.msk.bf16.mxu1 %vm384_vm13, %v1376_v54  ;;  %v386_v56 = vsel %vm384_vm13, %v1376_v54, 0  ;;  %v1378_v57 = vld [vmem:[%s1694_s2 + $0x2c] sm:$0xff]   ;;  %v1379_v58 = vld [vmem:[%s1694_s2 + $0x40] sm:$0xff]   ;;  %v1381_v60 = vld [vmem:[%s1694_s2 + $0x38] sm:$0xff]  }
  0x1a   :  { %1360 = vmatprep.subr.msk.bf16.mxu0 %vm384_vm13, %v1375_v52  ;;  %1263 = vmatpush3.bf16.msra.mxu1 %v386_v56  ;;  %v1380_v59 = vld [vmem:[%s1694_s2 + $0x24] sm:$0xff]   ;;  %v1382_v61 = vld [vmem:[%s1694_s2 + $0x1c] sm:$0xff]   ;;  %v1384_v63 = vld [vmem:[%s1694_s2 + $0x18] ss:$0 sps:$4 sm:$0x11]   ;;  %vm371_vm14 = vcmask 408576  }
  0x1b   :  { %1264 = vmatprep.subr.bf16.mxu1 %v1378_v57  ;;  %v1383_v62 = vld [vmem:[%s1694_s2 + $0x88] ss:$0 sps:$4 sm:$0x11]   ;;  %v1385_v16 = vld [vmem:[%s1694_s2 + $0x80] sm:$0xff]   ;;  %vm1427_vm15 = vmmov 0   ;;  %s1428_s19 = smov [#allocation2]  }
  0x1c   :  { %v810_v15 = vsel %vm384_vm13, %v1383_v62, 0 }
  0x1e   :  { %1265 = vmatpush3.bf16.msra.mxu1 %v1378_v57 }
  0x1f   :  { %1266 = vmatprep.subr.bf16.mxu1 %v1380_v59 }
  0x22   :  { %1267 = vmatpush3.bf16.msra.mxu1 %v1380_v59 }
  0x23   :  { %1268 = vmatprep.subr.bf16.mxu1 %v1382_v61 }
  0x26   :  { %1269 = vmatpush3.bf16.msra.mxu1 %v1382_v61 }
  0x27   :  { %1359 = vmatprep.subr.msk.bf16.mxu1 %vm384_vm13, %v1384_v63 }
  0x7d   :  { %v53_v21 = vpop.permute.xlu1 %52  ;;  %v47_v22 = vpop.permute.xlu0 %46 }
  0x7e   :  { %vm83_vm0 = vcmp.eq.s32.totalorder %v53_v21, %v44_v20  ;;  %vm81_vm1 = vcmp.eq.s32.totalorder %v47_v22, %v44_v20 }
  0x7f   :  { %v1068_v26 = vsel %vm83_vm0, 1.0, %v1426_v25  ;;  %v1066_v27 = vsel %vm81_vm1, 1.0, %v1426_v25  ;;  %vm885_vm0 = vcmask 261120  }
  0x81   :  { %v56_v23 = vpop.permute.xlu1 %55  ;;  %v50_v24 = vpop.permute.xlu0 %49 }
  0x82   :  { %vm84_vm2 = vcmp.eq.s32.totalorder %v56_v23, %v44_v20  ;;  %vm82_vm3 = vcmp.eq.s32.totalorder %v50_v24, %v44_v20  ;;  %v491_v24 = vsel %vm384_vm13, %v1384_v63, 0 }
  0x83   :  { %v1069_v28 = vsel %vm84_vm2, 1.0, %v1426_v25  ;;  %v1067_v29 = vsel %vm82_vm3, 1.0, %v1426_v25 }
  0x84   :  { %v1175_v30 = vpack.c.bf16 %v1069_v28, %v1068_v26  ;;  %v1174_v31 = vpack.c.bf16 %v1067_v29, %v1066_v27  ;;  %v1386_v27 = vld [vmem:[%s1694_s2 + $0x10] sm:$0xff]   ;;  %v1387_v29 = vld [vmem:[%s1694_s2 + $0x78] sm:$0xff]  }
  0x85   :  { %v62_v32 = vpop.permute.xlu1 %61  ;;  %v59_v33 = vpop.permute.xlu0 %58 }
  0x86   :  { %vm86_vm5 = vcmp.eq.s32.totalorder %v62_v32, %v44_v20  ;;  %vm85_vm6 = vcmp.eq.s32.totalorder %v59_v33, %v44_v20  ;;  %1250 = vmatprep.mubr.msk.bf16.mxu0 %vm207_vm4, %v1174_v31  ;;  %v1388_v32 = vld [vmem:[%s1694_s2 + $0x8] sm:$0xff]   ;;  %v1389_v33 = vld [vmem:[%s1694_s2 + $0x70] sm:$0xff]  }
  0x87   :  { %v1071_v34 = vsel %vm86_vm5, 1.0, %v1426_v25  ;;  %v1070_v35 = vsel %vm85_vm6, 1.0, %v1426_v25  ;;  %1251 = vmatmul.mubr.msk.bf16.vlgmr.msra.gmra.mxu0 %vm207_vm4, %v1175_v30 }
  0x88   :  { %v1176_v36 = vpack.c.bf16 %v1071_v34, %v1070_v35  ;;  %1295 = vmatpush3.bf16.msra.mxu0 %v592_v53 }
  0x89   :  { %v68_v37 = vpop.permute.xlu1 %67  ;;  %v65_v38 = vpop.permute.xlu0 %64  ;;  %1296 = vmatprep.subr.bf16.mxu0 %v1377_v55 }
  0x8a   :  { %vm88_vm7 = vcmp.eq.s32.totalorder %v68_v37, %v44_v20  ;;  %vm87_vm8 = vcmp.eq.s32.totalorder %v65_v38, %v44_v20  ;;  %1254 = vmatprep.mubr.msk.bf16.mxu0 %vm207_vm4, %v1176_v36  ;;  %v1390_v37 = vld [vmem:[%s1694_s2] sm:$0xff]   ;;  %v1391_v38 = vld [vmem:[%s1694_s2 + $0x6c] ss:$0 sps:$4 sm:$0x11]  }
  0x8b   :  { %v1073_v39 = vsel %vm88_vm7, 1.0, %v1426_v25  ;;  %v1072_v40 = vsel %vm87_vm8, 1.0, %v1426_v25 }
  0x8c   :  { %v1177_v41 = vpack.c.bf16 %v1073_v39, %v1072_v40  ;;  %1297 = vmatpush3.bf16.msra.mxu0 %v1377_v55  ;;  %v701_v39 = vsel %vm384_vm13, %v1391_v38, 0  ;;  %v1392_v40 = vld [vmem:[%s1694_s2 + $0x64] sm:$0xff]  }
  0x8d   :  { %v74_v42 = vpop.permute.xlu1 %73  ;;  %v71_v43 = vpop.permute.xlu0 %70  ;;  %1298 = vmatprep.subr.bf16.mxu0 %v1379_v58 }
  0x8e   :  { %vm90_vm9 = vcmp.eq.s32.totalorder %v74_v42, %v44_v20  ;;  %vm89_vm10 = vcmp.eq.s32.totalorder %v71_v43, %v44_v20  ;;  %v1394_v43 = vld [vmem:[%s1694_s2 + $0x54] sm:$0xff]  }
  0x8f   :  { %v1075_v44 = vsel %vm90_vm9, 1.0, %v1426_v25  ;;  %v1074_v45 = vsel %vm89_vm10, 1.0, %v1426_v25  ;;  %1255 = vmatmul.mubr.msk.bf16.gmra.mxu0 %vm207_vm4, %v1177_v41  ;;  %v1393_v41 = vld [vmem:[%s1694_s2 + $0x5c] sm:$0xff]  }
  0x90   :  { %v1178_v46 = vpack.c.bf16 %v1075_v44, %v1074_v45  ;;  %1299 = vmatpush3.bf16.msra.mxu0 %v1379_v58 }
  0x91   :  { %v80_v47 = vpop.permute.xlu1 %79  ;;  %v77_v48 = vpop.permute.xlu0 %76  ;;  %1300 = vmatprep.subr.bf16.mxu0 %v1381_v60 }
  0x92   :  { %vm92_vm11 = vcmp.eq.s32.totalorder %v80_v47, %v44_v20  ;;  %vm91_vm12 = vcmp.eq.s32.totalorder %v77_v48, %v44_v20  ;;  %1258 = vmatprep.mubr.msk.bf16.mxu0 %vm207_vm4, %v1178_v46  ;;  %v1395_v47 = vld [vmem:[%s1696_s4 + $0x8] sm:$0xff]   ;;  %v1396_v48 = vld [vmem:[%s1696_s4] sm:$0xff]  }
  0x93   :  { %v1077_v49 = vsel %vm92_vm11, 1.0, %v1426_v25  ;;  %v1076_v50 = vsel %vm91_vm12, 1.0, %v1426_v25 }
  0x94   :  { %v1179_v51 = vpack.c.bf16 %v1077_v49, %v1076_v50  ;;  %1301 = vmatpush3.bf16.msra.mxu0 %v1381_v60 }
  0x95   :  { %1362 = vmatprep.subr.msk.bf16.mxu0 %vm384_vm13, %v1383_v62 }
  0x97   :  { %1259 = vmatmul.mubr.msk.bf16.gmra.mxu0 %vm207_vm4, %v1179_v51 }
 0x147   :  { %v1252_v0 = vpop.f32.mrf.mxu0 }
 0x149   :  { %v260_v1 = vpop.f32.mrf.mxu0 }
 0x14b   :  { %v1253_v2 = vpop.f32.mrf.mxu0 }
 0x14c   :  { %v1582_v3 = vpack.c.bf16 %v1253_v2, %v1252_v0 }
 0x14d   :  { %v263_v4 = vpop.f32.mrf.mxu0 }
 0x14e   :  { %v307_v5 = vpack.c.bf16 %v263_v4, %v260_v1  ;;  %1302 = vmatprep.mubr.msk.bf16.mxu0 %vm371_vm14, %v1582_v3  ;;  %v321_v8 = vunpack.c.l.b16 %v1582_v3  ;;  %v322_v18 = vunpack.c.h.b16 %v1582_v3 }
 0x14f   :  { %v1256_v6 = vpop.f32.mrf.mxu0 }
 0x150   :  { %v320_v7 = vunpack.c.h.b16 %v307_v5 }
 0x151   :  { %v276_v9 = vpop.f32.mrf.mxu0 }
 0x152   :  { %v346_v10 = vpack.c.b16 %v321_v8, %v320_v7 }
 0x153   :  { %v1257_v11 = vpop.f32.mrf.mxu0 }
 0x154   :  { %v1587_v12 = vpack.c.bf16 %v1257_v11, %v1256_v6  ;;  %1270 = vmatprep.mubr.msk.bf16.mxu1 %vm371_vm14, %v346_v10 }
 0x155   :  { %v279_v13 = vpop.f32.mrf.mxu0 }
 0x156   :  { %v309_v14 = vpack.c.bf16 %v279_v13, %v276_v9  ;;  %v325_v21 = vunpack.c.l.b16 %v1587_v12  ;;  %v326_v35 = vunpack.c.h.b16 %v1587_v12 }
 0x157   :  { %v1260_v17 = vpop.f32.mrf.mxu0 }
 0x158   :  { %1303 = vmatmul.mubr.msk.bf16.vlgmr.msra.gmra.mxu0 %vm371_vm14, %v309_v14  ;;  %v323_v19 = vunpack.c.l.b16 %v309_v14  ;;  %v324_v20 = vunpack.c.h.b16 %v309_v14 }
 0x159   :  { %v292_v22 = vpop.f32.mrf.mxu0  ;;  %1306 = vmatprep.mubr.msk.bf16.mxu0 %vm371_vm14, %v1587_v12  ;;  %1327 = vmatpush3.bf16.msra.mxu0 %v810_v15 }
 0x15a   :  { %v347_v23 = vpack.c.b16 %v323_v19, %v322_v18  ;;  %1328 = vmatprep.subr.bf16.mxu0 %v1385_v16  ;;  %v348_v26 = vpack.c.b16 %v325_v21, %v324_v20 }
 0x15b   :  { %v1261_v28 = vpop.f32.mrf.mxu0 }
 0x15c   :  { %1271 = vmatmul.mubr.msk.bf16.vlgmr.msra.gmra.mxu1 %vm371_vm14, %v347_v23  ;;  %v312_v42 = vpack.c.bf16 %v1261_v28, %v1260_v17 }
 0x15d   :  { %1279 = vmatpush3.bf16.msra.mxu1 %v491_v24  ;;  %v295_v30 = vpop.f32.mrf.mxu0  ;;  %1274 = vmatprep.mubr.msk.bf16.mxu1 %vm371_vm14, %v348_v26 }
 0x15e   :  { %v311_v31 = vpack.c.bf16 %v295_v30, %v292_v22  ;;  %1329 = vmatpush3.bf16.msra.mxu0 %v1385_v16  ;;  %1280 = vmatprep.subr.bf16.mxu1 %v1386_v27  ;;  %v329_v45 = vunpack.c.l.b16 %v312_v42 }
 0x15f   :  { %1330 = vmatprep.subr.bf16.mxu0 %v1387_v29 }
 0x160   :  { %v327_v34 = vunpack.c.l.b16 %v311_v31  ;;  %1307 = vmatmul.mubr.msk.bf16.gmra.mxu0 %vm371_vm14, %v311_v31  ;;  %v328_v44 = vunpack.c.h.b16 %v311_v31 }
 0x161   :  { %1281 = vmatpush3.bf16.msra.mxu1 %v1386_v27  ;;  %1334 = vmatprep.mubr.msk.bf16.mxu0 %vm371_vm14, %v309_v14 }
 0x162   :  { %1331 = vmatpush3.bf16.msra.mxu0 %v1387_v29  ;;  %1282 = vmatprep.subr.bf16.mxu1 %v1388_v32  ;;  %v349_v36 = vpack.c.b16 %v327_v34, %v326_v35  ;;  %v675_v46 = vpack.c.b16 %v329_v45, %v328_v44 }
 0x163   :  { %1332 = vmatprep.subr.bf16.mxu0 %v1389_v33 }
 0x164   :  { %1275 = vmatmul.mubr.msk.bf16.gmra.mxu1 %vm371_vm14, %v349_v36 }
 0x165   :  { %1283 = vmatpush3.bf16.msra.mxu1 %v1388_v32  ;;  %1286 = vmatprep.mubr.msk.bf16.mxu1 %vm371_vm14, %v307_v5 }
 0x166   :  { %1333 = vmatpush3.bf16.msra.mxu0 %v1389_v33  ;;  %1284 = vmatprep.subr.bf16.mxu1 %v1390_v37 }
 0x169   :  { %1285 = vmatpush3.bf16.msra.mxu1 %v1390_v37  ;;  %1335 = vmatmul.mubr.msk.bf16.vlgmr.msra.gmra.mxu0 %vm371_vm14, %v1587_v12 }
 0x16a   :  { %1338 = vmatprep.mubr.msk.bf16.mxu0 %vm371_vm14, %v311_v31  ;;  %1361 = vmatprep.subr.msk.bf16.mxu1 %vm384_vm13, %v1391_v38 }
 0x16c   :  { %1287 = vmatmul.mubr.msk.bf16.vlgmr.msra.gmra.mxu1 %vm371_vm14, %v1582_v3 }
 0x16d   :  { %1311 = vmatpush3.bf16.msra.mxu1 %v701_v39  ;;  %1290 = vmatprep.mubr.msk.bf16.mxu1 %vm371_vm14, %v309_v14 }
 0x16e   :  { %1312 = vmatprep.subr.bf16.mxu1 %v1392_v40 }
 0x171   :  { %1313 = vmatpush3.bf16.msra.mxu1 %v1392_v40  ;;  %1339 = vmatmul.mubr.msk.bf16.gmra.mxu0 %vm371_vm14, %v312_v42 }
 0x172   :  { %1314 = vmatprep.subr.bf16.mxu1 %v1393_v41 }
 0x174   :  { %1291 = vmatmul.mubr.msk.bf16.gmra.mxu1 %vm371_vm14, %v1587_v12 }
 0x175   :  { %1315 = vmatpush3.bf16.msra.mxu1 %v1393_v41  ;;  %1318 = vmatprep.mubr.msk.bf16.mxu1 %vm371_vm14, %v347_v23 }
 0x176   :  { %1316 = vmatprep.subr.bf16.mxu1 %v1394_v43 }
 0x179   :  { %1317 = vmatpush3.bf16.msra.mxu1 %v1394_v43 }
 0x17a   :  { %1342 = vmatprep.subr.bf16.mxu1 %v1426_v25 }
 0x17c   :  { %1319 = vmatmul.mubr.msk.bf16.vlgmr.msra.gmra.mxu1 %vm371_vm14, %v348_v26 }
 0x17d   :  { %1322 = vmatprep.mubr.msk.bf16.mxu1 %vm371_vm14, %v349_v36  ;;  %1343 = vmatpush3.bf16.msra.mxu1 %v1395_v47 }
 0x17e   :  { %1344 = vmatprep.subr.bf16.mxu1 %v1426_v25 }
 0x181   :  { %1345 = vmatpush3.bf16.msra.mxu1 %v1396_v48 }
 0x182   :  { %1350 = vmatprep.subr.bf16.mxu1 %v1426_v25 }
 0x184   :  { %1323 = vmatmul.mubr.msk.bf16.gmra.mxu1 %vm371_vm14, %v675_v46 }
 0x185   :  { %1346 = vmatprep.mubr.msk.bf16.mxu1 %vm1427_vm15, %v1426_v25 }
 0x218   :  { %v1304_v49 = vpop.f32.mrf.mxu0 }
 0x21a   :  { %v628_v50 = vpop.f32.mrf.mxu0 }
 0x21c   :  { %v1272_v51 = vpop.f32.mrf.mxu1  ;;  %v1305_v52 = vpop.f32.mrf.mxu0 }
 0x21e   :  { %v422_v53 = vpop.f32.mrf.mxu1  ;;  %v631_v54 = vpop.f32.mrf.mxu0 }
 0x220   :  { %v1273_v55 = vpop.f32.mrf.mxu1  ;;  %v1308_v56 = vpop.f32.mrf.mxu0 }
 0x222   :  { %v425_v57 = vpop.f32.mrf.mxu1  ;;  %v644_v58 = vpop.f32.mrf.mxu0 }
 0x224   :  { %v1276_v59 = vpop.f32.mrf.mxu1  ;;  %v1309_v61 = vpop.f32.mrf.mxu0 }
 0x226   :  { %v438_v60 = vpop.f32.mrf.mxu1  ;;  %v647_v0 = vpop.f32.mrf.mxu0 }
 0x228   :  { %v1277_v62 = vpop.f32.mrf.mxu1 }
 0x229   :  { %v1336_v3 = vpop.f32.mrf.mxu0 }
 0x22a   :  { %v441_v63 = vpop.f32.mrf.mxu1 }
 0x22b   :  { %v846_v6 = vpop.f32.mrf.mxu0 }
 0x22c   :  { %v1288_v1 = vpop.f32.mrf.mxu1 }
 0x22d   :  { %v1337_v9 = vpop.f32.mrf.mxu0  ;;  %v536_v17 = vadd.f32 %v1288_v1, %v1272_v51 }
 0x22e   :  { %v527_v2 = vpop.f32.mrf.mxu1 }
 0x22f   :  { %v849_v12 = vpop.f32.mrf.mxu0  ;;  %v528_v18 = vadd.f32 %v527_v2, %v422_v53  ;;  %v661_v29 = vadd.f32 %v1304_v49, %v536_v17 }
 0x230   :  { %v1289_v4 = vpop.f32.mrf.mxu1 }
 0x231   :  { %v539_v14 = vadd.f32 %v1289_v4, %v1273_v55  ;;  %v1340_v19 = vpop.f32.mrf.mxu0  ;;  %v659_v30 = vadd.f32 %v628_v50, %v528_v18 }
 0x232   :  { %v530_v5 = vpop.f32.mrf.mxu1 }
 0x233   :  { %v531_v21 = vadd.f32 %v530_v5, %v425_v57  ;;  %v662_v23 = vadd.f32 %v1305_v52, %v539_v14  ;;  %v862_v28 = vpop.f32.mrf.mxu0  ;;  %v1398_v14 = vld [vmem:[%s1698_s6] sm:$0xff]  }
 0x234   :  { %v1292_v7 = vpop.f32.mrf.mxu1 }
 0x235   :  { %v552_v16 = vadd.f32 %v1292_v7, %v1276_v59  ;;  %v660_v34 = vadd.f32 %v631_v54, %v531_v21  ;;  %v1341_v43 = vpop.f32.mrf.mxu0 }
 0x236   :  { %v543_v8 = vpop.f32.mrf.mxu1 }
 0x237   :  { %v544_v22 = vadd.f32 %v543_v8, %v438_v60  ;;  %v665_v27 = vadd.f32 %v1308_v56, %v552_v16  ;;  %v865_v56 = vpop.f32.mrf.mxu0  ;;  %v1164_v8 = vld [vmem:[%s1695_s3] ss:$0 sm:$0xff] }
 0x238   :  { %v1293_v10 = vpop.f32.mrf.mxu1 }
 0x239   :  { %v555_v26 = vadd.f32 %v1293_v10, %v1277_v62  ;;  %v663_v36 = vadd.f32 %v644_v58, %v544_v22 }
 0x23a   :  { %v546_v11 = vpop.f32.mrf.mxu1 }
 0x23b   :  { %v547_v33 = vadd.f32 %v546_v11, %v441_v63  ;;  %v666_v42 = vadd.f32 %v1309_v61, %v555_v26 }
 0x23c   :  { %v1320_v13 = vpop.f32.mrf.mxu1 }
 0x23d   :  { %v770_v37 = vadd.f32 %v1320_v13, %v661_v29  ;;  %v664_v49 = vadd.f32 %v647_v0, %v547_v33 }
 0x23e   :  { %v737_v15 = vpop.f32.mrf.mxu1 }
 0x23f   :  { %v768_v39 = vadd.f32 %v737_v15, %v659_v30  ;;  %v879_v50 = vadd.f32 %v1336_v3, %v770_v37 }
 0x240   :  { %v1321_v20 = vpop.f32.mrf.mxu1 }
 0x241   :  { %v771_v31 = vadd.f32 %v1321_v20, %v662_v23  ;;  %v877_v52 = vadd.f32 %v846_v6, %v768_v39  ;;  %v888_v63 = vsel %vm885_vm0, %v879_v50, -inf }
 0x242   :  { %v740_v24 = vpop.f32.mrf.mxu1 }
 0x243   :  { %v769_v40 = vadd.f32 %v740_v24, %v660_v34  ;;  %v880_v44 = vadd.f32 %v1337_v9, %v771_v31  ;;  %v886_v0 = vsel %vm885_vm0, %v877_v52, -inf }
 0x244   :  { %v1324_v32 = vpop.f32.mrf.mxu1 }
 0x245   :  { %v774_v35 = vadd.f32 %v1324_v32, %v665_v27  ;;  %v878_v53 = vadd.f32 %v849_v12, %v769_v40  ;;  %v889_v57 = vsel %vm885_vm0, %v880_v44, -inf  ;;  %v1397_v12 = vld [vmem:[%s1698_s6 + $0x8] sm:$0xff]  }
 0x246   :  { %v753_v38 = vpop.f32.mrf.mxu1 }
 0x247   :  { %v772_v41 = vadd.f32 %v753_v38, %v663_v36  ;;  %v883_v46 = vadd.f32 %v1340_v19, %v774_v35  ;;  %v887_v1 = vsel %vm885_vm0, %v878_v53, -inf  ;;  %v1169_v19 = vld [vmem:[%s1699_s7] ss:$0 sm:$0xff]  ;;  %s1058_s7 = sshll.u32 %s1428_s19, 4  ;;  %s1059_s7 = int_to_ptr.vmem [resolvable:$true] %s1058_s7 }
 0x248   :  { %v1325_v45 = vpop.f32.mrf.mxu1  ;;  %s1403_s20 = scalar_lea.vmem %s1059_s7, 128  ;;  %p1408_p1 = scmp.lt.s32.totalorder %s1059_s7, %s1059_s7 }
 0x249   :  { %v881_v47 = vadd.f32 %v862_v28, %v772_v41  ;;  %v775_v48 = vadd.f32 %v1325_v45, %v666_v42  ;;  %v894_v58 = vsel %vm885_vm0, %v883_v46, -inf  ;;  %v1165_v28 = vld [vmem:[%s1697_s5] ss:$0 sm:$0xff]  ;;  %p1404_p0 = scmp.ne.s32.totalorder %s1059_s7, %s1403_s20  ;;  %p1409_p2 = scmp.lt.s32.totalorder %s1403_s20, %s1403_s20 }
 0x24a   :  { %v756_v51 = vpop.f32.mrf.mxu1  ;;  %v895_v3 = vmax.f32 %v888_v63, %v894_v58 }
 0x24b   :  { %v884_v54 = vadd.f32 %v1341_v43, %v775_v48  ;;  %v773_v55 = vadd.f32 %v756_v51, %v664_v49  ;;  %v890_v59 = vsel %vm885_vm0, %v881_v47, -inf  ;;  %p1410_p3 = por %p1409_p2, %p1408_p1 }
 0x24c   :  { %v891_v4 = vmax.f32 %v886_v0, %v890_v59 }
 0x24d   :  { %v896_v60 = vsel %vm885_vm0, %v884_v54, -inf  ;;  %v882_v61 = vadd.f32 %v865_v56, %v773_v55  ;;  %p1411_p4 = pnand %p1410_p3, %p1404_p0 }
 0x24e   :  { %v897_v62 = vmax.f32 %v889_v57, %v896_v60 }
 0x24f   :  { %v892_v2 = vsel %vm885_vm0, %v882_v61, -inf }
 0x250   :  { %v893_v5 = vmax.f32 %v887_v1, %v892_v2  ;;  %v899_v6 = vmax.f32 %v895_v3, %v897_v62 }
 0x252   :  { %v898_v7 = vmax.f32 %v891_v4, %v893_v5 }
 0x254   :  { %v900_v9 = vmax.f32 %v898_v7, %v899_v6 }
 0x256   :  { %v908_v10 = vadd.f32 %v1164_v8, %v900_v9 }
 0x258   :  { %v909_v11 = vmax.f32 %v908_v10, 0.0 }
 0x25a   :  { %v910_v13 = vpack.c.bf16 %v909_v11, %v909_v11 }
 0x25c   :  { %1347 = vmatmul.mubr.msk.bf16.vlgmr.msra.gmra.mxu1 %vm885_vm0, %v910_v13 }
 0x25d   :  { %1351 = vmatpush3.bf16.msra.mxu1 %v1397_v12  ;;  %1354 = vmatprep.mubr.msk.bf16.mxu1 %vm1427_vm15, %v1426_v25 }
 0x25e   :  { %1352 = vmatprep.subr.bf16.mxu1 %v1426_v25 }
 0x261   :  { %1353 = vmatpush3.bf16.msra.mxu1 %v1398_v14 }
 0x264   :  { %1355 = vmatmul.mubr.msk.bf16.vlgmr.msra.gmra.mxu1 %vm885_vm0, %v910_v13 }
 0x31c   :  { %v971_v15 = vpop.f32.mrf.mxu1 }
 0x31d   :  { %v972_v29 = vadd.f32 %v1165_v28, %v971_v15 }
 0x31e   :  { %v1348_v16 = vpop.f32.mrf.mxu1 }
 0x31f   :  { %v977_v31 = vmax.f32 %v972_v29, 0.0 }
 0x320   :  { %v974_v17 = vpop.f32.mrf.mxu1 }
 0x322   :  { %v1349_v18 = vpop.f32.mrf.mxu1 }
 0x324   :  { %v1035_v20 = vpop.f32.mrf.mxu1 }
 0x325   :  { %v1036_v21 = vadd.f32 %v1169_v19, %v1035_v20 }
 0x326   :  { %v1356_v22 = vpop.f32.mrf.mxu1 }
 0x327   :  { %v1173_v23 = vmul.f32 -1.442695, %v1036_v21 }
 0x328   :  { %v1038_v24 = vpop.f32.mrf.mxu1 }
 0x329   :  { %1399 = vpow2.f32 %v1173_v23 }
 0x32a   :  { %v1357_v26 = vpop.f32.mrf.mxu1 }
 0x336   :  { %v1400_v27 = vpop.eup %1399 }
 0x337   :  { %v1044_v25 = vadd.f32 1.0, %v1400_v27 }
 0x339   :  { %1401 = vrcp.f32 %v1044_v25 }
 0x346   :  { %v1402_v30 = vpop.eup %1401 }
 0x347   :  { %v1048_v32 = vsub.f32 1.0, %v1402_v30  ;;  %v1047_v33 = vmul.f32 %v1402_v30, %v977_v31 }
 0x349   :  { %v1049_v34 = vmul.f32 %v1048_v32, %v909_v11 }
 0x34b   :  { %v1050_v35 = vadd.f32 %v1049_v34, %v1047_v33 }
 0x34d   :  { %1051 = vst.msk [vmem:[#allocation2] sm:$0xff] %vm885_vm0, %v1050_v35 }
 0x34e   :  { %1414 = shalt.err (!%p1411_p4)
}
 0x34f   :  { %1061 = dma.vmem_to_hbm [thread:$0]  %s1059_s7, 128, %s1700_s8, [#allocation3]  }
 0x350   :  { %1423 = dma.done.wait [#allocation3], 128  }
 0x351   :  { %1424 = vsyncadd [#allocation3], 4294967168 }
 0x352   :  { %1065 = vsyncpa [#allocation3], 1 }

</bundles_post_ra>
